<compile_context>
chip_gen: v6e
topology: v6e:2x2x1
jax: 0.10.0
libtpu: 0.0.40
codegen_flags: <defaults>
</compile_context>

<pallas_src>
import functools
import math

import jax
import jax.numpy as jnp
from jax.experimental import pallas as pl
from jax.experimental.pallas import tpu as pltpu

LANE = 128


def _round_up(n, m):
    return ((n + m - 1) // m) * m


def _pad_cols(w, width):
    """Zero-pad the last (lane) dimension of a (rows, cols) array to `width`."""
    if w.shape[1] == width:
        return w
    return jnp.zeros((w.shape[0], width), w.dtype).at[:, : w.shape[1]].set(w)


def _vmem_capacity_bytes():
    try:
        return int(pltpu.get_tpu_info().vmem_capacity_bytes)
    except Exception:
        return 64 * 1024 * 1024  # v7x-safe fallback (64 MiB physical VMEM)


def _pick_batch_tile(batch, per_row_bytes, weight_bytes):
    """Largest multiple-of-8 batch tile fitting the per-generation VMEM budget.

    Keeps the grid >= 2 steps when the batch is large enough so the "parallel"
    batch axis can shard across the two v7x TensorCores.
    """
    vmem_cap = _vmem_capacity_bytes()
    budget = int(vmem_cap * 0.4)              # headroom for compiler scratch etc.
    avail = max(budget - weight_bytes, 8 * per_row_bytes)
    bb = max(8, min(512, (avail // per_row_bytes) // 8 * 8))
    if batch <= 8:
        bb = batch                            # a single full-extent block
    elif bb >= batch:
        # >= 2 grid steps for megacore sharding; below 16 rows one block is cheaper.
        bb = _round_up((batch + 1) // 2, 8) if batch >= 16 else batch
    vmem_limit = weight_bytes + 2 * bb * per_row_bytes + (8 << 20)
    vmem_limit = int(min(max(vmem_limit, 32 << 20), int(0.9 * vmem_cap)))
    return bb, vmem_limit


# -----------------------------------------------------------------------------
# Kernels
# -----------------------------------------------------------------------------
def grumn_attention_kernel(
    x_ref, h_ref, mem_ref,
    w_xgi_ref, b_big_ref, w_th_ref, wh_ref, vw_ref, whh_ref, bgh_ref,
    out_ref,
    *, H, Ap, Hp,
):
    """Memory-tape path: self-attention over the memory tape + GRU update.

    Per batch tile (bb rows):
      x   (bb, I)        h (bb, H)        mem (bb, T, H)
      w_xgi (I, Ap+3Hp)  = [W_x | W_ih_r | W_ih_u | W_ih_n]  (lane-padded segments)
      b_big (1, Ap+3Hp)  = [b_h+b_x+b_th | b_ihr+b_hhr | b_ihu+b_hhu | b_ihn]
      w_th  (H, Ap)      W_tilde_h
      wh    (H, Ap)      W_h   (its bias is folded into b_big)
      vw    (1, Ap)      attention score vector (v bias dropped: softmax-shift-invariant)
      whh   (H, 3Hp), bgh (1, 3Hp) = [0 | 0 | b_hh_n]
      out (bb, 2H) = [new_hidden | aggregated_hidden], written as two direct slices.

    Ap/Hp are multiples of 128, so every wide slice below is lane-aligned; the
    padded lanes carry zero weights/biases and cannot affect the real outputs.
    """
    x = x_ref[...]
    h = h_ref[...]
    mem = mem_ref[...]
    bb, T, _ = mem.shape
    cdt = w_xgi_ref.dtype                      # MXU operand dtype (f32 or bf16)

    # ---- fused x-side projection: [att_ctx_x | gi_r | gi_u | gi_n] ----------
    fused = jnp.dot(x.astype(cdt), w_xgi_ref[...],
                    preferred_element_type=jnp.float32) + b_big_ref[...]
    # Hidden contribution to the attention context (small second MXU push; this
    # replaces the wrapper-side [x|h] concat and the zero (H,3H) weight block).
    att_ctx = fused[:, :Ap] + jnp.dot(h.astype(cdt), w_th_ref[...],
                                      preferred_element_type=jnp.float32)

    # ---- attention scores over the memory tape ------------------------------
    # (bb,T,H)->(bb*T,H) is a tile-aligned (free) view whenever T % 8 == 0; the
    # rank-2 dot avoids relying on rank-3 dot_general lowering inside Mosaic.
    mem_c = mem.astype(cdt)
    h_exp = jnp.dot(mem_c.reshape(bb * T, H), wh_ref[...],
                    preferred_element_type=jnp.float32).reshape(bb, T, Ap)
    att_in = jnp.tanh(h_exp + att_ctx[:, None, :])
    scores = jnp.sum(att_in * vw_ref[...], axis=-1)             # (bb, T)

    # ---- stabilized softmax over T (reciprocal on the EUP) -------------------
    m = jnp.max(scores, axis=1, keepdims=True)
    e = jnp.exp(scores - m)
    att_w = e * pl.reciprocal(jnp.sum(e, axis=1, keepdims=True), approx=True)

    # ---- aggregate the memory tape -------------------------------------------
    # Kept as VPU multiply + XLU sublane-reduce: per-row (M=1) batched matvecs
    # underutilize the MXU. TODO(synk): revisit with a trace at large bb.
    agg = jnp.sum(att_w[:, :, None] * mem.astype(jnp.float32), axis=1)   # (bb, H)

    # ---- GRU update (gh kept separate: the reset gate scales only h_n) -------
    gh = jnp.dot(agg.astype(cdt), whh_ref[...],
                 preferred_element_type=jnp.float32) + bgh_ref[...]
    r = jax.nn.sigmoid(fused[:, Ap:Ap + Hp] + gh[:, :Hp])
    u = jax.nn.sigmoid(fused[:, Ap + Hp:Ap + 2 * Hp] + gh[:, Hp:2 * Hp])
    n = jnp.tanh(fused[:, Ap + 2 * Hp:] + r * gh[:, 2 * Hp:])
    new_h = (1.0 - u[:, :H]) * n[:, :H] + u[:, :H] * agg

    # Two direct slice writes into the packed slab (no in-vreg concatenate);
    # fully lane-dense when H % 128 == 0.
    out_ref[:, :H] = new_h.astype(out_ref.dtype)
    out_ref[:, H:] = agg.astype(out_ref.dtype)


def grumn_nomem_kernel(x_ref, h_ref, wx_ref, bx_ref, wh_ref, bh_ref, out_ref,
                       *, H, Hp):
    """No memory tape: aggregated_hidden == hidden; only new_hidden is stored.

    wx (I, 3Hp) = [W_ih_r | W_ih_u | W_ih_n]   bx = [b_ihr+b_hhr | b_ihu+b_hhu | b_ihn]
    wh (H, 3Hp) = [W_hh_r | W_hh_u | W_hh_n]   bh = [0 | 0 | b_hhn]
    """
    x = x_ref[...]
    h = h_ref[...]
    cdt = wx_ref.dtype
    gi = jnp.dot(x.astype(cdt), wx_ref[...],
                 preferred_element_type=jnp.float32) + bx_ref[...]
    gh = jnp.dot(h.astype(cdt), wh_ref[...],
                 preferred_element_type=jnp.float32) + bh_ref[...]
    r = jax.nn.sigmoid(gi[:, :Hp] + gh[:, :Hp])
    u = jax.nn.sigmoid(gi[:, Hp:2 * Hp] + gh[:, Hp:2 * Hp])
    n = jnp.tanh(gi[:, 2 * Hp:] + r * gh[:, 2 * Hp:])
    new_h = (1.0 - u[:, :H]) * n[:, :H] + u[:, :H] * h.astype(jnp.float32)
    out_ref[...] = new_h.astype(out_ref.dtype)


# -----------------------------------------------------------------------------
# Wrapper module
# -----------------------------------------------------------------------------
def _linear_init(key, fan_in, fan_out):
    """torch.nn.Linear default init: U(-1/sqrt(fan_in), 1/sqrt(fan_in))."""
    kw, kb = jax.random.split(key)
    bound = 1.0 / math.sqrt(fan_in)
    w = jax.random.uniform(kw, (fan_in, fan_out), jnp.float32, -bound, bound)
    b = jax.random.uniform(kb, (1, fan_out), jnp.float32, -bound, bound)
    return w, b


class GRUMemoryNetworkCell:
    """JAX/Pallas port of the PyTorch GRUMemoryNetworkCell."""

    def __init__(self, input_size, hidden_size, attention_size, key,
                 param_dtype=jnp.float32):
        self.input_size = input_size
        self.hidden_size = hidden_size
        self.attention_size = attention_size
        self.param_dtype = param_dtype        # bf16 weights on v6e/v7x; f32 math stays f32
        ks = jax.random.split(key, 6)
        self.weight_ih = _linear_init(ks[0], input_size, 3 * hidden_size)
        self.weight_hh = _linear_init(ks[1], hidden_size, 3 * hidden_size)
        self.W_h = _linear_init(ks[2], hidden_size, attention_size)
        self.W_x = _linear_init(ks[3], input_size, attention_size)
        self.W_tilde_h = _linear_init(ks[4], hidden_size, attention_size)
        v_w, v_b = _linear_init(ks[5], attention_size, 1)
        # v as a (1, A) row; the bias is kept for the reference but dropped in
        # the kernel (softmax is shift-invariant, so it cannot affect outputs).
        self.v = (v_w.T, v_b)
        self._build_fused_params()

    # ---- one-time fused / lane-padded parameter layout -----------------------
    def _build_fused_params(self):
        I, H, A = self.input_size, self.hidden_size, self.attention_size
        Ap = _round_up(A, LANE)
        Hp = _round_up(H, LANE)
        self.Ap, self.Hp = Ap, Hp
        pdt = self.param_dtype

        wih, bih = self.weight_ih          # (I, 3H), (1, 3H)
        whh, bhh = self.weight_hh          # (H, 3H), (1, 3H)
        wh, bh = self.W_h                  # (H, A), (1, A)
        wx, bx = self.W_x
        wth, bth = self.W_tilde_h

        # Input-side GRU gate weights/biases, one lane-aligned segment per gate
        # (the r/u hidden biases are folded into the input-side bias).
        gi_w = jnp.concatenate(
            [_pad_cols(wih[:, :H], Hp),
             _pad_cols(wih[:, H:2 * H], Hp),
             _pad_cols(wih[:, 2 * H:], Hp)], axis=1)                      # (I, 3Hp)
        gi_b = jnp.concatenate(
            [_pad_cols(bih[:, :H] + bhh[:, :H], Hp),
             _pad_cols(bih[:, H:2 * H] + bhh[:, H:2 * H], Hp),
             _pad_cols(bih[:, 2 * H:], Hp)], axis=1)                      # (1, 3Hp)

        # Hidden-side GRU gate weights (shared by both paths); only the new-gate
        # bias stays on the hidden side (it is scaled by the reset gate).
        self.whh_p = jnp.concatenate(
            [_pad_cols(whh[:, :H], Hp),
             _pad_cols(whh[:, H:2 * H], Hp),
             _pad_cols(whh[:, 2 * H:], Hp)], axis=1).astype(pdt)          # (H, 3Hp)
        self.bgh_p = jnp.concatenate(
            [jnp.zeros((1, 2 * Hp), jnp.float32),
             _pad_cols(bhh[:, 2 * H:], Hp)], axis=1)                      # (1, 3Hp)

        # Attention path: fused x-side projection [att_ctx | gi] with all three
        # attention biases (W_h, W_x, W_tilde_h) pre-summed.
        self.att_w_xgi = jnp.concatenate(
            [_pad_cols(wx, Ap), gi_w], axis=1).astype(pdt)                # (I, Ap+3Hp)
        self.att_b_big = jnp.concatenate(
            [_pad_cols(bh + bx + bth, Ap), gi_b], axis=1)                 # (1, Ap+3Hp)
        self.att_w_th = _pad_cols(wth, Ap).astype(pdt)                    # (H, Ap)
        self.att_wh = _pad_cols(wh, Ap).astype(pdt)                       # (H, Ap)
        self.att_vw = _pad_cols(self.v[0], Ap)                            # (1, Ap), f32

        # No-memory path reuses the same padded gate layout.
        self.nm_wx = gi_w.astype(pdt)                                     # (I, 3Hp)
        self.nm_bx = gi_b                                                 # (1, 3Hp)

    # ---- Pallas forward ------------------------------------------------------
    def forward(self, input_tensor, hidden, memory_tape=None):
        # TODO(synk): if this cell is driven step-by-step over a sequence with a
        # fixed memory tape, hoist mem @ W_h out of the per-step kernel and/or
        # move the time recurrence inside one pallas_call (grid over timesteps,
        # weights resident, hidden carried in VMEM scratch).
        B = input_tensor.shape[0]
        I, H = self.input_size, self.hidden_size
        Ap, Hp = self.Ap, self.Hp

        use_mem = memory_tape is not None and memory_tape.shape[1] > 0

        def nbytes(a):
            return int(a.size) * a.dtype.itemsize

        if use_mem:
            T = memory_tape.shape[1]
            weights = (self.att_w_xgi, self.att_b_big, self.att_w_th, self.att_wh,
                       self.att_vw, self.whh_p, self.bgh_p)
            # per-batch-row bytes: double-buffered I/O tiles + rough f32 working set
            io_row = 2 * (4 * I + 4 * H + memory_tape.dtype.itemsize * T * H + 4 * 2 * H)
            work_row = 4 * ((Ap + 3 * Hp) + 3 * T * Ap + 2 * T * H + 8 * Hp)
        else:
            weights = (self.nm_wx, self.nm_bx, self.whh_p, self.bgh_p)
            io_row = 2 * (4 * I + 4 * H + 4 * H)
            work_row = 4 * (10 * Hp)
        weight_bytes = 2 * sum(nbytes(w) for w in weights)
        bb, vmem_limit = _pick_batch_tile(B, io_row + work_row, weight_bytes)
        grid = (pl.cdiv(B, bb),)

        def row_spec(width):
            return pl.BlockSpec((bb, width), lambda i: (i, 0))

        def const_spec(w):                     # resident weights: constant index map
            nd = w.ndim
            return pl.BlockSpec(w.shape, lambda i, _nd=nd: (0,) * _nd)

        cparams = pltpu.CompilerParams(
            dimension_semantics=("parallel",),  # batch tiles shard across TensorCores
            vmem_limit_bytes=vmem_limit,
        )

        if use_mem:
            T = memory_tape.shape[1]
            kernel = functools.partial(grumn_attention_kernel, H=H, Ap=Ap, Hp=Hp)
            args = (input_tensor, hidden, memory_tape,
                    self.att_w_xgi, self.att_b_big, self.att_w_th, self.att_wh,
                    self.att_vw, self.whh_p, self.bgh_p)
            # TODO(synk): try pipeline_mode=pl.Buffered(3) on the memory-tape spec
            # once a trace shows the (bb, T, H) DMA exposed at large bb.
            in_specs = ([row_spec(I), row_spec(H),
                         pl.BlockSpec((bb, T, H), lambda i: (i, 0, 0))]
                        + [const_spec(w) for w in args[3:]])
            packed = pl.pallas_call(
                kernel,
                out_shape=jax.ShapeDtypeStruct((B, 2 * H), jnp.float32),
                grid=grid,
                in_specs=in_specs,
                out_specs=pl.BlockSpec((bb, 2 * H), lambda i: (i, 0)),
                compiler_params=cparams,
            )(*args)
            return packed[:, :H], packed[:, H:]

        kernel = functools.partial(grumn_nomem_kernel, H=H, Hp=Hp)
        args = (input_tensor, hidden, self.nm_wx, self.nm_bx, self.whh_p, self.bgh_p)
        in_specs = [row_spec(I), row_spec(H)] + [const_spec(w) for w in args[2:]]
        new_h = pl.pallas_call(
            kernel,
            out_shape=jax.ShapeDtypeStruct((B, H), jnp.float32),
            grid=grid,
            in_specs=in_specs,
            out_specs=pl.BlockSpec((bb, H), lambda i: (i, 0)),
            compiler_params=cparams,
        )(*args)
        # aggregated_hidden == hidden on this path: return it directly instead of
        # copying it through the kernel (halves the output store / writeback DMA).
        return new_h, hidden

    # ---- pure-JAX reference (unfused f32 params, incl. the v bias) -----------
    def forward_ref(self, x, h, mem=None):
        if mem is not None and mem.shape[1] > 0:
            T = mem.shape[1]
            h_exp = mem @ self.W_h[0] + self.W_h[1]
            x_exp = jnp.broadcast_to((x @ self.W_x[0] + self.W_x[1])[:, None, :],
                                     (x.shape[0], T, self.attention_size))
            th_exp = jnp.broadcast_to((h @ self.W_tilde_h[0] + self.W_tilde_h[1])[:, None, :],
                                      (x.shape[0], T, self.attention_size))
            att_in = jnp.tanh(h_exp + x_exp + th_exp)
            scores = jnp.sum(att_in * self.v[0], axis=-1) + self.v[1][0, 0]
            w = jax.nn.softmax(scores, axis=1)
            agg = jnp.sum(w[:, :, None] * mem, axis=1)
        else:
            agg = h
        gi = x @ self.weight_ih[0] + self.weight_ih[1]
        gh = agg @ self.weight_hh[0] + self.weight_hh[1]
        H = self.hidden_size
        i_r, i_u, i_n = gi[:, :H], gi[:, H:2 * H], gi[:, 2 * H:]
        h_r, h_u, h_n = gh[:, :H], gh[:, H:2 * H], gh[:, 2 * H:]
        r = jax.nn.sigmoid(i_r + h_r)
        u = jax.nn.sigmoid(i_u + h_u)
        n = jnp.tanh(i_n + r * h_n)
        return (1.0 - u) * n + u * agg, agg


# -----------------------------------------------------------------------------
# Main
# -----------------------------------------------------------------------------
if __name__ == "__main__":
    B, I, H, A, T = 4, 16, 32, 24, 8

    key = jax.random.PRNGKey(0)
    k_params, k_x, k_h, k_m = jax.random.split(key, 4)

    cell = GRUMemoryNetworkCell(input_size=I, hidden_size=H, attention_size=A,
                                key=k_params)

    x = jax.random.normal(k_x, (B, I), jnp.float32)
    h = jax.random.normal(k_h, (B, H), jnp.float32)
    mem = jax.random.normal(k_m, (B, T, H), jnp.float32)

    # --- memory-tape (attention) path ---
    new_h, agg = jax.block_until_ready(cell.forward(x, h, mem))
    ref_new_h, ref_agg = cell.forward_ref(x, h, mem)

    # --- no-memory path ---
    new_h0, agg0 = jax.block_until_ready(cell.forward(x, h, None))
    ref_new_h0, ref_agg0 = cell.forward_ref(x, h, None)

    # Attention path uses an approximate (EUP) reciprocal in the softmax.
    assert jnp.allclose(new_h, ref_new_h, atol=1e-2, rtol=1e-2)
    assert jnp.allclose(agg, ref_agg, atol=1e-2, rtol=1e-2)
    # No-memory path is exact up to f32 rounding / bias re-association.
    assert jnp.allclose(new_h0, ref_new_h0, atol=1e-5, rtol=1e-5)
    assert jnp.allclose(agg0, ref_agg0, atol=1e-5, rtol=1e-5)

    # --- bf16 resident weights (v6e/v7x MXU path); f32 accumulation/activations ---
    cell_bf16 = GRUMemoryNetworkCell(input_size=I, hidden_size=H, attention_size=A,
                                     key=k_params, param_dtype=jnp.bfloat16)
    new_h_b, agg_b = jax.block_until_ready(cell_bf16.forward(x, h, mem))
    assert jnp.allclose(new_h_b, ref_new_h, atol=1e-1, rtol=1e-1)
    assert jnp.allclose(agg_b, ref_agg, atol=1e-1, rtol=1e-1)

    # --- larger batch: exercises the multi-step grid / batch-tiling path ---
    B2 = 32
    k2x, k2h, k2m = jax.random.split(jax.random.PRNGKey(1), 3)
    x2 = jax.random.normal(k2x, (B2, I), jnp.float32)
    h2 = jax.random.normal(k2h, (B2, H), jnp.float32)
    mem2 = jax.random.normal(k2m, (B2, T, H), jnp.float32)
    new_h2, agg2 = jax.block_until_ready(cell.forward(x2, h2, mem2))
    ref_new_h2, ref_agg2 = cell.forward_ref(x2, h2, mem2)
    assert jnp.allclose(new_h2, ref_new_h2, atol=1e-2, rtol=1e-2)
    assert jnp.allclose(agg2, ref_agg2, atol=1e-2, rtol=1e-2)

    print("KERNEL_OK")
</pallas_src>

<mosaic_0001>
module attributes {stable_mosaic.version = 11 : i64} {
  func.func @grumn_attention_kernel(%arg0: i32, %arg1: memref<4x16xf32, #tpu.memory_space<vmem>>, %arg2: memref<4x32xf32, #tpu.memory_space<vmem>>, %arg3: memref<4x8x32xf32, #tpu.memory_space<vmem>>, %arg4: memref<16x512xf32, #tpu.memory_space<vmem>>, %arg5: memref<1x512xf32, #tpu.memory_space<vmem>>, %arg6: memref<32x128xf32, #tpu.memory_space<vmem>>, %arg7: memref<32x128xf32, #tpu.memory_space<vmem>>, %arg8: memref<1x128xf32, #tpu.memory_space<vmem>>, %arg9: memref<32x384xf32, #tpu.memory_space<vmem>>, %arg10: memref<1x384xf32, #tpu.memory_space<vmem>>, %arg11: memref<4x64xf32, #tpu.memory_space<vmem>>) attributes {dimension_semantics = [#tpu.dimension_semantics<parallel>], iteration_bounds = array<i64: 1>, scalar_prefetch = 0 : i64, scratch_operands = 0 : i64, tpu.core_type = #tpu.core_type<tc>, window_params = [{transform_indices = @transform_0, window_bounds = array<i64: 4, 16>}, {transform_indices = @transform_1, window_bounds = array<i64: 4, 32>}, {transform_indices = @transform_2, window_bounds = array<i64: 4, 8, 32>}, {pipeline_mode = #tpu.pipeline_mode<synchronous>, transform_indices = @transform_3, window_bounds = array<i64: 16, 512>}, {pipeline_mode = #tpu.pipeline_mode<synchronous>, transform_indices = @transform_4, window_bounds = array<i64: 1, 512>}, {pipeline_mode = #tpu.pipeline_mode<synchronous>, transform_indices = @transform_5, window_bounds = array<i64: 32, 128>}, {pipeline_mode = #tpu.pipeline_mode<synchronous>, transform_indices = @transform_6, window_bounds = array<i64: 32, 128>}, {pipeline_mode = #tpu.pipeline_mode<synchronous>, transform_indices = @transform_7, window_bounds = array<i64: 1, 128>}, {pipeline_mode = #tpu.pipeline_mode<synchronous>, transform_indices = @transform_8, window_bounds = array<i64: 32, 384>}, {pipeline_mode = #tpu.pipeline_mode<synchronous>, transform_indices = @transform_9, window_bounds = array<i64: 1, 384>}, {transform_indices = @transform_10, window_bounds = array<i64: 4, 64>}]} {
    %c0 = arith.constant 0 : index
    %c0_0 = arith.constant 0 : index
    %0 = vector.load %arg1[%c0, %c0_0] : memref<4x16xf32, #tpu.memory_space<vmem>>, vector<4x16xf32>
    %c0_1 = arith.constant 0 : index
    %c0_2 = arith.constant 0 : index
    %1 = vector.load %arg2[%c0_1, %c0_2] : memref<4x32xf32, #tpu.memory_space<vmem>>, vector<4x32xf32>
    %c0_3 = arith.constant 0 : index
    %c0_4 = arith.constant 0 : index
    %c0_5 = arith.constant 0 : index
    %2 = vector.load %arg3[%c0_3, %c0_4, %c0_5] : memref<4x8x32xf32, #tpu.memory_space<vmem>>, vector<4x8x32xf32>
    %c0_6 = arith.constant 0 : index
    %c0_7 = arith.constant 0 : index
    %3 = vector.load %arg4[%c0_6, %c0_7] : memref<16x512xf32, #tpu.memory_space<vmem>>, vector<16x512xf32>
    %cst = arith.constant dense<0.000000e+00> : vector<4x512xf32>
    %4 = tpu.matmul %0, %3, %cst {dimension_numbers = #tpu.dot_dimension_numbers<[1], [0], [0], [1], [0, 0, 1, 1], [], []>} : vector<4x16xf32>, vector<16x512xf32>, vector<4x512xf32> -> vector<4x512xf32>
    %c0_8 = arith.constant 0 : index
    %c0_9 = arith.constant 0 : index
    %5 = vector.load %arg5[%c0_8, %c0_9] : memref<1x512xf32, #tpu.memory_space<vmem>>, vector<1x512xf32>
    %6 = vector.broadcast %5 : vector<1x512xf32> to vector<4x512xf32>
    %7 = arith.addf %4, %6 : vector<4x512xf32>
    %8 = vector.extract_strided_slice %7 {offsets = [0, 0], sizes = [4, 128], strides = [1, 1]} : vector<4x512xf32> to vector<4x128xf32>
    %c0_10 = arith.constant 0 : index
    %c0_11 = arith.constant 0 : index
    %9 = vector.load %arg6[%c0_10, %c0_11] : memref<32x128xf32, #tpu.memory_space<vmem>>, vector<32x128xf32>
    %cst_12 = arith.constant dense<0.000000e+00> : vector<4x128xf32>
    %10 = tpu.matmul %1, %9, %cst_12 {dimension_numbers = #tpu.dot_dimension_numbers<[1], [0], [0], [1], [0, 0, 1, 1], [], []>} : vector<4x32xf32>, vector<32x128xf32>, vector<4x128xf32> -> vector<4x128xf32>
    %11 = arith.addf %8, %10 : vector<4x128xf32>
    %12 = vector.shape_cast %2 : vector<4x8x32xf32> to vector<32x32xf32>
    %c0_13 = arith.constant 0 : index
    %c0_14 = arith.constant 0 : index
    %13 = vector.load %arg7[%c0_13, %c0_14] : memref<32x128xf32, #tpu.memory_space<vmem>>, vector<32x128xf32>
    %cst_15 = arith.constant dense<0.000000e+00> : vector<32x128xf32>
    %14 = tpu.matmul %12, %13, %cst_15 {dimension_numbers = #tpu.dot_dimension_numbers<[1], [0], [0], [1], [0, 0, 1, 1], [], []>} : vector<32x32xf32>, vector<32x128xf32>, vector<32x128xf32> -> vector<32x128xf32>
    %15 = vector.shape_cast %14 : vector<32x128xf32> to vector<4x8x128xf32>
    %16 = vector.shape_cast %11 : vector<4x128xf32> to vector<4x1x128xf32>
    %17 = vector.broadcast %16 : vector<4x1x128xf32> to vector<4x8x128xf32>
    %18 = arith.addf %15, %17 : vector<4x8x128xf32>
    %19 = math.tanh %18 : vector<4x8x128xf32>
    %c0_16 = arith.constant 0 : index
    %c0_17 = arith.constant 0 : index
    %20 = vector.load %arg8[%c0_16, %c0_17] : memref<1x128xf32, #tpu.memory_space<vmem>>, vector<1x128xf32>
    %21 = vector.shape_cast %20 : vector<1x128xf32> to vector<1x1x128xf32>
    %22 = vector.broadcast %21 : vector<1x1x128xf32> to vector<4x8x128xf32>
    %23 = arith.mulf %19, %22 : vector<4x8x128xf32>
    %cst_18 = arith.constant dense<0.000000e+00> : vector<4x8xf32>
    %24 = vector.multi_reduction <add>, %23, %cst_18 [2] : vector<4x8x128xf32> to vector<4x8xf32>
    %cst_19 = arith.constant dense<0xFF800000> : vector<4xf32>
    %25 = vector.multi_reduction <maximumf>, %24, %cst_19 [1] : vector<4x8xf32> to vector<4xf32>
    %26 = vector.shape_cast %25 : vector<4xf32> to vector<4x1xf32>
    %27 = vector.broadcast %26 : vector<4x1xf32> to vector<4x8xf32>
    %28 = arith.subf %24, %27 : vector<4x8xf32>
    %29 = math.exp %28 : vector<4x8xf32>
    %cst_20 = arith.constant dense<0.000000e+00> : vector<4xf32>
    %30 = vector.multi_reduction <add>, %29, %cst_20 [1] : vector<4x8xf32> to vector<4xf32>
    %31 = vector.shape_cast %30 : vector<4xf32> to vector<4x1xf32>
    %32 = tpu.reciprocal %31 {approx = true} : vector<4x1xf32> -> vector<4x1xf32>
    %33 = vector.broadcast %32 : vector<4x1xf32> to vector<4x8xf32>
    %34 = arith.mulf %29, %33 : vector<4x8xf32>
    %35 = vector.shape_cast %34 : vector<4x8xf32> to vector<4x8x1xf32>
    %36 = vector.broadcast %35 : vector<4x8x1xf32> to vector<4x8x32xf32>
    %37 = arith.mulf %36, %2 : vector<4x8x32xf32>
    %cst_21 = arith.constant dense<0.000000e+00> : vector<4x32xf32>
    %38 = vector.multi_reduction <add>, %37, %cst_21 [1] : vector<4x8x32xf32> to vector<4x32xf32>
    %c0_22 = arith.constant 0 : index
    %c0_23 = arith.constant 0 : index
    %39 = vector.load %arg9[%c0_22, %c0_23] : memref<32x384xf32, #tpu.memory_space<vmem>>, vector<32x384xf32>
    %cst_24 = arith.constant dense<0.000000e+00> : vector<4x384xf32>
    %40 = tpu.matmul %38, %39, %cst_24 {dimension_numbers = #tpu.dot_dimension_numbers<[1], [0], [0], [1], [0, 0, 1, 1], [], []>} : vector<4x32xf32>, vector<32x384xf32>, vector<4x384xf32> -> vector<4x384xf32>
    %c0_25 = arith.constant 0 : index
    %c0_26 = arith.constant 0 : index
    %41 = vector.load %arg10[%c0_25, %c0_26] : memref<1x384xf32, #tpu.memory_space<vmem>>, vector<1x384xf32>
    %42 = vector.broadcast %41 : vector<1x384xf32> to vector<4x384xf32>
    %43 = arith.addf %40, %42 : vector<4x384xf32>
    %44 = vector.extract_strided_slice %7 {offsets = [0, 128], sizes = [4, 128], strides = [1, 1]} : vector<4x512xf32> to vector<4x128xf32>
    %45 = vector.extract_strided_slice %43 {offsets = [0, 0], sizes = [4, 128], strides = [1, 1]} : vector<4x384xf32> to vector<4x128xf32>
    %46 = arith.addf %44, %45 : vector<4x128xf32>
    %47 = arith.negf %46 : vector<4x128xf32>
    %48 = math.exp %47 : vector<4x128xf32>
    %cst_27 = arith.constant 1.000000e+00 : f32
    %49 = vector.broadcast %cst_27 : f32 to vector<4x128xf32>
    %50 = arith.addf %49, %48 : vector<4x128xf32>
    %51 = arith.divf %49, %50 : vector<4x128xf32>
    %52 = vector.extract_strided_slice %7 {offsets = [0, 256], sizes = [4, 128], strides = [1, 1]} : vector<4x512xf32> to vector<4x128xf32>
    %53 = vector.extract_strided_slice %43 {offsets = [0, 128], sizes = [4, 128], strides = [1, 1]} : vector<4x384xf32> to vector<4x128xf32>
    %54 = arith.addf %52, %53 : vector<4x128xf32>
    %55 = arith.negf %54 : vector<4x128xf32>
    %56 = math.exp %55 : vector<4x128xf32>
    %cst_28 = arith.constant 1.000000e+00 : f32
    %57 = vector.broadcast %cst_28 : f32 to vector<4x128xf32>
    %58 = arith.addf %57, %56 : vector<4x128xf32>
    %59 = arith.divf %57, %58 : vector<4x128xf32>
    %60 = vector.extract_strided_slice %7 {offsets = [0, 384], sizes = [4, 128], strides = [1, 1]} : vector<4x512xf32> to vector<4x128xf32>
    %61 = vector.extract_strided_slice %43 {offsets = [0, 256], sizes = [4, 128], strides = [1, 1]} : vector<4x384xf32> to vector<4x128xf32>
    %62 = arith.mulf %51, %61 : vector<4x128xf32>
    %63 = arith.addf %60, %62 : vector<4x128xf32>
    %64 = math.tanh %63 : vector<4x128xf32>
    %65 = vector.extract_strided_slice %59 {offsets = [0, 0], sizes = [4, 32], strides = [1, 1]} : vector<4x128xf32> to vector<4x32xf32>
    %cst_29 = arith.constant 1.000000e+00 : f32
    %66 = vector.broadcast %cst_29 : f32 to vector<4x32xf32>
    %67 = arith.subf %66, %65 : vector<4x32xf32>
    %68 = vector.extract_strided_slice %64 {offsets = [0, 0], sizes = [4, 32], strides = [1, 1]} : vector<4x128xf32> to vector<4x32xf32>
    %69 = arith.mulf %67, %68 : vector<4x32xf32>
    %70 = vector.extract_strided_slice %59 {offsets = [0, 0], sizes = [4, 32], strides = [1, 1]} : vector<4x128xf32> to vector<4x32xf32>
    %71 = arith.mulf %70, %38 : vector<4x32xf32>
    %72 = arith.addf %69, %71 : vector<4x32xf32>
    %c0_30 = arith.constant 0 : index
    %c0_31 = arith.constant 0 : index
    %73 = vector.load %arg11[%c0_30, %c0_31] : memref<4x64xf32, #tpu.memory_space<vmem>>, vector<4x32xf32>
    tpu.vector_store %arg11[%c0_30, %c0_31], %72 {strides = array<i32>} : memref<4x64xf32, #tpu.memory_space<vmem>>, vector<4x32xf32>,
    %c0_32 = arith.constant 0 : index
    %c32 = arith.constant 32 : index
    %74 = vector.load %arg11[%c0_32, %c32] : memref<4x64xf32, #tpu.memory_space<vmem>>, vector<4x32xf32>
    tpu.vector_store %arg11[%c0_32, %c32], %38 {strides = array<i32>} : memref<4x64xf32, #tpu.memory_space<vmem>>, vector<4x32xf32>,
    return
  }
  func.func @transform_0(%arg0: i32) -> (i32, i32) {
    %c0_i32 = arith.constant 0 : i32
    %c0_i32_0 = arith.constant 0 : i32
    return %arg0, %c0_i32 : i32, i32
  }
  func.func @transform_1(%arg0: i32) -> (i32, i32) {
    %c0_i32 = arith.constant 0 : i32
    %c0_i32_0 = arith.constant 0 : i32
    return %arg0, %c0_i32 : i32, i32
  }
  func.func @transform_2(%arg0: i32) -> (i32, i32, i32) {
    %c0_i32 = arith.constant 0 : i32
    %c0_i32_0 = arith.constant 0 : i32
    %c0_i32_1 = arith.constant 0 : i32
    return %arg0, %c0_i32, %c0_i32_0 : i32, i32, i32
  }
  func.func @transform_3(%arg0: i32) -> (i32, i32) {
    %c0_i32 = arith.constant 0 : i32
    %c0_i32_0 = arith.constant 0 : i32
    %c0_i32_1 = arith.constant 0 : i32
    return %c0_i32, %c0_i32_0 : i32, i32
  }
  func.func @transform_4(%arg0: i32) -> (i32, i32) {
    %c0_i32 = arith.constant 0 : i32
    %c0_i32_0 = arith.constant 0 : i32
    %c0_i32_1 = arith.constant 0 : i32
    return %c0_i32, %c0_i32_0 : i32, i32
  }
  func.func @transform_5(%arg0: i32) -> (i32, i32) {
    %c0_i32 = arith.constant 0 : i32
    %c0_i32_0 = arith.constant 0 : i32
    %c0_i32_1 = arith.constant 0 : i32
    return %c0_i32, %c0_i32_0 : i32, i32
  }
  func.func @transform_6(%arg0: i32) -> (i32, i32) {
    %c0_i32 = arith.constant 0 : i32
    %c0_i32_0 = arith.constant 0 : i32
    %c0_i32_1 = arith.constant 0 : i32
    return %c0_i32, %c0_i32_0 : i32, i32
  }
  func.func @transform_7(%arg0: i32) -> (i32, i32) {
    %c0_i32 = arith.constant 0 : i32
    %c0_i32_0 = arith.constant 0 : i32
    %c0_i32_1 = arith.constant 0 : i32
    return %c0_i32, %c0_i32_0 : i32, i32
  }
  func.func @transform_8(%arg0: i32) -> (i32, i32) {
    %c0_i32 = arith.constant 0 : i32
    %c0_i32_0 = arith.constant 0 : i32
    %c0_i32_1 = arith.constant 0 : i32
    return %c0_i32, %c0_i32_0 : i32, i32
  }
  func.func @transform_9(%arg0: i32) -> (i32, i32) {
    %c0_i32 = arith.constant 0 : i32
    %c0_i32_0 = arith.constant 0 : i32
    %c0_i32_1 = arith.constant 0 : i32
    return %c0_i32, %c0_i32_0 : i32, i32
  }
  func.func @transform_10(%arg0: i32) -> (i32, i32) {
    %c0_i32 = arith.constant 0 : i32
    %c0_i32_0 = arith.constant 0 : i32
    return %arg0, %c0_i32 : i32, i32
  }
}

</mosaic_0001>

<bundles_post_ra>
// kernel: tpu_custom_call.1
= control target key start
LH: loop header
LB: loop body
LE: loop exit
PB: predicated region body
PF: predicated region fallthrough
CT: control target
= control target key end

     0   :  { %15 = vsyncpa [#allocation3], 0  ;;  %s1474_s0 = inlined_call_operand.hbm [shape: f32[4,16], index: 0, kind: input, shape index: {}]   ;;  %s1475_s1 = inlined_call_operand.hbm [shape: f32[4,32], index: 1, kind: input, shape index: {}]   ;;  %s1476_s2 = inlined_call_operand.hbm [shape: f32[4,8,32], index: 2, kind: input, shape index: {}]   ;;  %s1477_s3 = inlined_call_operand.hbm [shape: f32[16,512], index: 3, kind: input, shape index: {}]   ;;  %s1478_s4 = inlined_call_operand.vmem [shape: f32[1,512], index: 4, kind: input, shape index: {}]   ;;  %s1479_s5 = inlined_call_operand.hbm [shape: f32[32,128], index: 5, kind: input, shape index: {}]   ;;  %s1480_s6 = inlined_call_operand.hbm [shape: f32[32,128], index: 6, kind: input, shape index: {}]   ;;  %s1481_s7 = inlined_call_operand.vmem [shape: f32[1,128], index: 7, kind: input, shape index: {}]   ;;  %s1482_s8 = inlined_call_operand.hbm [shape: f32[32,384], index: 8, kind: input, shape index: {}]   ;;  %s1483_s9 = inlined_call_operand.vmem [shape: f32[1,384], index: 9, kind: input, shape index: {}]   ;;  %s1484_s10 = inlined_call_operand.hbm [shape: f32[4,64], index: 10, kind: output, shape index: {}]  }
   0x1   :  { %16 = vsyncpa [#allocation6], 0 }
   0x2   :  { %17 = vsyncpa [#allocation9], 0 }
   0x3   :  { %18 = vsyncpa [#allocation12], 0 }
   0x4   :  { %19 = vsyncpa [#allocation4], 0  ;;  %s1254_s13 = smov [#allocation5]   ;;  %s1255_s15 = smov [#allocation8]  }
   0x5   :  { %s36_s14 = sshll.u32 %s1254_s13, 4  ;;  %s57_s16 = sshll.u32 %s1255_s15, 4  ;;  %s37_s14 = int_to_ptr.vmem [resolvable:$true] %s36_s14  ;;  %s58_s16 = int_to_ptr.vmem [resolvable:$true] %s57_s16 }
   0x6   :  { %s1092_s17 = scalar_lea.vmem %s37_s14, 64  ;;  %p1097_p1 = scmp.lt.s32.totalorder %s37_s14, %s37_s14 }
   0x7   :  { %p1093_p0 = scmp.ne.s32.totalorder %s37_s14, %s1092_s17  ;;  %p1098_p2 = scmp.lt.s32.totalorder %s1092_s17, %s1092_s17 }
   0x9   :  { %p1099_p3 = por %p1098_p2, %p1097_p1 }
   0xb   :  { %p1100_p4 = pnand %p1099_p3, %p1093_p0 }
   0xd   :  { %1103 = shalt.err (!%p1100_p4)
}
   0xe   :  { %39 = dma.hbm_to_vmem [thread:$0]  %s1475_s1, 64, %s37_s14, [#allocation6]  }
   0xf   :  { %s1112_s20 = scalar_lea.vmem %s58_s16, 1024  ;;  %p1117_p6 = scmp.lt.s32.totalorder %s58_s16, %s58_s16 }
  0x10   :  { %p1113_p5 = scmp.ne.s32.totalorder %s58_s16, %s1112_s20  ;;  %p1118_p7 = scmp.lt.s32.totalorder %s1112_s20, %s1112_s20 }
  0x12   :  { %p1119_p8 = por %p1118_p7, %p1117_p6 }
  0x14   :  { %p1120_p9 = pnand %p1119_p8, %p1113_p5 }
  0x16   :  { %1123 = shalt.err (!%p1120_p9)
}
  0x17   :  { %s1256_s21 = smov 512   ;;  %s1257_s22 = smov 32  }
  0x18   :  { %63 = dma.hbm_to_vmem [thread:$0]  %s1477_s3, 1024, %s58_s16, [#allocation9], %s1256_s21, %s1256_s21, %s1257_s22  }
  0x19   :  { %s1258_s25 = smov [#allocation11]   ;;  %s1259_s27 = smov [#allocation2]  }
  0x1a   :  { %s83_s26 = sshll.u32 %s1258_s25, 4  ;;  %s26_s28 = sshll.u32 %s1259_s27, 4  ;;  %s84_s26 = int_to_ptr.vmem [resolvable:$true] %s83_s26  ;;  %s27_s28 = int_to_ptr.vmem [resolvable:$true] %s26_s28 }
  0x1b   :  { %s1132_s1 = scalar_lea.vmem %s84_s26, 512  ;;  %p1137_p11 = scmp.lt.s32.totalorder %s84_s26, %s84_s26 }
  0x1c   :  { %p1133_p10 = scmp.ne.s32.totalorder %s84_s26, %s1132_s1  ;;  %p1138_p12 = scmp.lt.s32.totalorder %s1132_s1, %s1132_s1 }
  0x1e   :  { %p1139_p13 = por %p1138_p12, %p1137_p11 }
  0x20   :  { %p1140_p0 = pnand %p1139_p13, %p1133_p10 }
  0x22   :  { %1143 = shalt.err (!%p1140_p0)
}
  0x23   :  { %s1260_s29 = smov 128   ;;  %s1261_s30 = smov 8  }
  0x24   :  { %89 = dma.hbm_to_vmem [thread:$0]  %s1480_s6, 512, %s84_s26, [#allocation12], %s1260_s29, %s1260_s29, %s1261_s30  }
  0x25   :  { %s1152_s12 = scalar_lea.vmem %s27_s28, 64  ;;  %p1157_p2 = scmp.lt.s32.totalorder %s27_s28, %s27_s28 }
  0x26   :  { %p1153_p1 = scmp.ne.s32.totalorder %s27_s28, %s1152_s12  ;;  %p1158_p3 = scmp.lt.s32.totalorder %s1152_s12, %s1152_s12 }
  0x28   :  { %p1159_p4 = por %p1158_p3, %p1157_p2 }
  0x2a   :  { %p1160_p5 = pnand %p1159_p4, %p1153_p1 }
  0x2c   :  { %1163 = shalt.err (!%p1160_p5)
}
  0x2d   :  { %29 = dma.hbm_to_vmem [thread:$0]  %s1474_s0, 64, %s27_s28, [#allocation3]  }
  0x2e   :  { %s1262_s15 = smov [#allocation7]   ;;  %s1263_s17 = smov [#allocation10]  }
  0x2f   :  { %s45_s16 = sshll.u32 %s1262_s15, 4  ;;  %s71_s18 = sshll.u32 %s1263_s17, 4  ;;  %s46_s16 = int_to_ptr.vmem [resolvable:$true] %s45_s16  ;;  %s72_s18 = int_to_ptr.vmem [resolvable:$true] %s71_s18 }
  0x30   :  { %s1172_s19 = scalar_lea.vmem %s46_s16, 512  ;;  %p1177_p7 = scmp.lt.s32.totalorder %s46_s16, %s46_s16 }
  0x31   :  { %p1173_p6 = scmp.ne.s32.totalorder %s46_s16, %s1172_s19  ;;  %p1178_p8 = scmp.lt.s32.totalorder %s1172_s19, %s1172_s19 }
  0x33   :  { %p1179_p9 = por %p1178_p8, %p1177_p7 }
  0x35   :  { %p1180_p10 = pnand %p1179_p9, %p1173_p6 }
  0x37   :  { %1183 = shalt.err (!%p1180_p10)
}
  0x38   :  { %51 = dma.hbm_to_vmem [thread:$0]  %s1476_s2, 512, %s46_s16, [#allocation6], %s1260_s29, %s1260_s29, %s1261_s30  }
  0x39   :  { %s1192_s0 = scalar_lea.vmem %s72_s18, 512  ;;  %p1197_p12 = scmp.lt.s32.totalorder %s72_s18, %s72_s18 }
  0x3a   :  { %p1193_p11 = scmp.ne.s32.totalorder %s72_s18, %s1192_s0  ;;  %p1198_p13 = scmp.lt.s32.totalorder %s1192_s0, %s1192_s0 }
  0x3c   :  { %p1199_p0 = por %p1198_p13, %p1197_p12 }
  0x3e   :  { %p1200_p1 = pnand %p1199_p0, %p1193_p11 }
  0x40   :  { %1203 = shalt.err (!%p1200_p1)
}
  0x41   :  { %77 = dma.hbm_to_vmem [thread:$0]  %s1479_s5, 512, %s72_s18, [#allocation9], %s1260_s29, %s1260_s29, %s1261_s30  }
  0x42   :  { %s1264_s24 = smov [#allocation13]  }
  0x43   :  { %s97_s25 = sshll.u32 %s1264_s24, 4  ;;  %s98_s25 = int_to_ptr.vmem [resolvable:$true] %s97_s25 }
  0x44   :  { %s1212_s26 = scalar_lea.vmem %s98_s25, 1536  ;;  %p1217_p3 = scmp.lt.s32.totalorder %s98_s25, %s98_s25 }
  0x45   :  { %p1213_p2 = scmp.ne.s32.totalorder %s98_s25, %s1212_s26  ;;  %p1218_p4 = scmp.lt.s32.totalorder %s1212_s26, %s1212_s26 }
  0x47   :  { %p1219_p5 = por %p1218_p4, %p1217_p3 }
  0x49   :  { %p1220_p6 = pnand %p1219_p5, %p1213_p2 }
  0x4b   :  { %1223 = shalt.err (!%p1220_p6)
}
  0x4c   :  { %s1265_s2 = smov 384   ;;  %s1266_s27 = smov 24  }
  0x4d   :  { %103 = dma.hbm_to_vmem [thread:$0]  %s1482_s8, 1536, %s98_s25, [#allocation12], %s1265_s2, %s1265_s2, %s1266_s27  }
  0x4e   :  { %1244 = dma.done.wait [#allocation3], 64  }
  0x4f   :  { %1245 = vsyncadd [#allocation3], 4294967232 }
  0x50   :  { %1246 = dma.done.wait [#allocation6], 576  }
  0x51   :  { %1247 = vsyncadd [#allocation6], 4294966720 }
  0x52   :  { %1248 = dma.done.wait [#allocation9], 1536  }
  0x53   :  { %1249 = vsyncadd [#allocation9], 4294965760 }
  0x54   :  { %1250 = dma.done.wait [#allocation12], 2048  }
  0x55   :  { %1251 = vsyncadd [#allocation12], 4294965248  ;;  %v1267_v0 = vmov 0.0   ;;  %v138_v1 = vld [vmem:[#allocation8 + $0x28] sm:$0xff]  ;;  %v137_v2 = vld [vmem:[#allocation8 + $0x20] sm:$0xff]  ;;  %vm163_vm0 = vcmask 130048   ;;  %v143_v23 = vlaneseq }
  0x56   :  { %231 = vmatprep.mubr.f32.mxu0 %v1267_v0  ;;  %302 = vmatprep.mubr.f32.mxu1 %v1267_v0  ;;  %v134_v3 = vld [vmem:[#allocation8 + $0x8] sm:$0xff]  ;;  %v140_v4 = vld [vmem:[#allocation8 + $0x38] sm:$0xff]  ;;  %v133_v5 = vld [vmem:[#allocation8] sm:$0xff]  ;;  %vm313_vm1 = vcmask 261120   ;;  %vm1268_vm2 = vmmov 0   ;;  %vm583_vm3 = vcmask 1041409  }
  0x57   :  { %195 = vmatprep.subr.mxu0 %v138_v1  ;;  %v139_v6 = vld [vmem:[#allocation8 + $0x30] sm:$0xff]  ;;  %266 = vmatprep.subr.mxu1 %v140_v4  ;;  %v127_v7 = vld [vmem:[#allocation2] sm:$0xf]  ;;  %v310_v14 = vld [vmem:[#allocation10 + $0x8] sm:$0xff]  ;;  %v1387_v24 = vshrl.u32 %v143_v23, 7  ;;  %v566_v4 = vand.u32 127, %v143_v23 }
  0x58   :  { %196 = vmatpush1.msra.mxu0 %v137_v2  ;;  %v136_v8 = vld [vmem:[#allocation8 + $0x18] sm:$0xff]  ;;  %267 = vmatpush1.msra.mxu1 %v139_v6  ;;  %v135_v9 = vld [vmem:[#allocation8 + $0x10] sm:$0xff]  ;;  %v389_v15 = vld [vmem:[#allocation11 + $0x8] sm:$0xff]  ;;  %v1269_v26 = vmov 1966171168   ;;  %vm585_vm4 = vcmask 1042434  }
  0x59   :  { %197 = vmatprep.subr.mxu0 %v134_v3  ;;  %v312_v10 = vld [vmem:[#allocation10 + $0x18] sm:$0xff]  ;;  %268 = vmatprep.subr.mxu1 %v136_v8  ;;  %v311_v12 = vld [vmem:[#allocation10 + $0x10] sm:$0xff]  ;;  %v309_v16 = vld [vmem:[#allocation10] sm:$0xff]  ;;  %v1390_v25 = vsub.s32 0, %v1387_v24  ;;  %v491_v27 = vunpack.c.l.s4 %v1269_v26  ;;  %v569_v6 = vsub.s32 %v566_v4, %v1387_v24  ;;  %vm587_vm5 = vcmask 1043459  }
  0x5a   :  { %198 = vmatpush1.msra.mxu0 %v133_v5  ;;  %v391_v11 = vld [vmem:[#allocation11 + $0x18] sm:$0xff]  ;;  %269 = vmatpush1.msra.mxu1 %v135_v9  ;;  %v390_v13 = vld [vmem:[#allocation11 + $0x10] sm:$0xff]  ;;  %v388_v18 = vld [vmem:[#allocation11] sm:$0xff]  ;;  %vm590_vm6 = vcmask 60416   ;;  %v1419_v23 = vsub.s32 1, %v1387_v24  ;;  %v1422_v26 = vsub.s32 2, %v1387_v24 }
  0x5b   :  { %970 = vmatmul.mubr.msk.f32.vlgmr.msra.gmra.mxu0 %vm163_vm0, %v127_v7  ;;  %1000 = vmatprep.subr.mxu0 %v1267_v0  ;;  %v128_v17 = vld [vmem:[#allocation5] sm:$0xf]  ;;  %v1366_v19 = vld [vmem:[#allocation7] sm:$0xff]  ;;  %v1369_v20 = vld [vmem:[#allocation7 + $0x8] sm:$0xff]  ;;  %v492_v31 = vunpack.c.0.s8 %v491_v27  ;;  %vm945_vm7 = vcmask 257024   ;;  %vm950_vm8 = vcmask 519424  }
  0x5c   :  { %1001 = vmatpush3.msra.mxu0 %v312_v10  ;;  %1011 = vmatprep.subr.mxu1 %v391_v11  ;;  %v1372_v21 = vld [vmem:[#allocation7 + $0x10] sm:$0xff]  ;;  %v1381_v22 = vld [vmem:[#allocation7 + $0x18] sm:$0xff] }
  0x5d   :  { %1002 = vmatprep.subr.mxu0 %v1267_v0  ;;  %971 = vmatmul.mubr.msk.f32.vlgmr.msra.gmra.mxu1 %vm163_vm0, %v127_v7  ;;  %v1395_v28 = vld [vmem:[%s1478_s4] sm:$0xf]  ;;  %v495_v35 = vsub.s32 %v492_v31, %v1387_v24 }
  0x5e   :  { %1003 = vmatpush3.msra.mxu0 %v311_v12  ;;  %1012 = vmatpush3.msra.mxu1 %v391_v11  ;;  %v146_v30 = vrot.slane %v1395_v28, %v1390_v25  ;;  %v977_v58 = vld [vmem:[%s1481_s7] ss:$0 sm:$0xff] }
  0x5f   :  { %1004 = vmatprep.subr.mxu0 %v1267_v0  ;;  %1013 = vmatprep.subr.mxu1 %v390_v13 }
  0x60   :  { %1005 = vmatpush3.msra.mxu0 %v310_v14  ;;  %1014 = vmatpush3.msra.mxu1 %v390_v13 }
  0x61   :  { %1006 = vmatprep.subr.mxu0 %v1267_v0  ;;  %1015 = vmatprep.subr.mxu1 %v389_v15 }
  0x62   :  { %1007 = vmatpush3.msra.mxu0 %v309_v16  ;;  %1008 = vmatprep.mubr.msk.f32.mxu0 %vm1268_vm2, %v1267_v0 }
  0x63   :  { %1016 = vmatpush3.msra.mxu1 %v389_v15  ;;  %1009 = vmatmul.mubr.msk.f32.vlgmr.msra.gmra.mxu0 %vm313_vm1, %v128_v17 }
  0x64   :  { %1017 = vmatprep.subr.mxu1 %v388_v18  ;;  %1019 = vmatprep.mubr.msk.f32.mxu1 %vm313_vm1, %v1366_v19 }
  0x65   :  { %1018 = vmatpush3.msra.mxu1 %v388_v18  ;;  %846 = vmatprep.mubr.f32.mxu0 %v1267_v0  ;;  %v1270_v18 = vmov 0  }
  0x66   :  { %1020 = vmatmul.mubr.msk.f32.vlgmr.msra.gmra.mxu1 %vm313_vm1, %v1369_v20  ;;  %1025 = vmatprep.subr.mxu1 %v1267_v0 }
  0x67   :  { %1022 = vmatprep.mubr.msk.f32.mxu1 %vm313_vm1, %v1372_v21  ;;  %1055 = vset.pattern.permute.xlu0 %v1270_v18 }
  0x68   :  { %1054 = vset.pattern.permute.xlu1 %v1270_v18  ;;  %v746_v18 = vld [vmem:[#allocation13 + $0x10] sm:$0xff] }
  0x6a   :  { %1023 = vmatmul.mubr.msk.f32.gmra.mxu1 %vm313_vm1, %v1381_v22 }
  0x6b   :  { %1033 = vmatprep.mubr.msk.f32.mxu1 %vm1268_vm2, %v1267_v0 }
 0x11b   :  { %v233_v29 = vpop.f32.mrf.mxu0 }
 0x11c   :  { %v234_v34 = vadd.f32 %v233_v29, %v146_v30  ;;  %v1425_v29 = vsub.s32 3, %v1387_v24 }
 0x11d   :  { %v1399_v32 = vpop.f32.mrf.mxu1  ;;  %v1401_v33 = vpop.f32.mrf.mxu0 }
 0x11f   :  { %v1404_v36 = vpop.f32.mrf.mxu1 }
 0x123   :  { %v383_v37 = vpop.f32.mrf.mxu0 }
 0x124   :  { %v387_v38 = vadd.f32 %v383_v37, %v234_v34 }
 0x125   :  { %v1010_v39 = vpop.f32.mrf.mxu0 }
 0x126   :  { %v1021_v40 = vpop.f32.mrf.mxu1  ;;  %v496_v41 = vrot.slane %v387_v38, %v495_v35 }
 0x128   :  { %v470_v42 = vpop.f32.mrf.mxu1  ;;  %v497_v43 = vcombine.high %v496_v41, %v496_v41  ;;  %v504_v44 = vrot.slane %v496_v41, %v495_v35 }
 0x12a   :  { %v1024_v45 = vpop.f32.mrf.mxu1  ;;  %v511_v46 = vrot.slane %v497_v43, %v495_v35  ;;  %v517_v47 = vrot.slane %v504_v44, %v1390_v25  ;;  %v512_v48 = vcombine.high %v504_v44, %v504_v44 }
 0x12c   :  { %v521_v49 = vrot.slane %v511_v46, %v1390_v25  ;;  %v534_v50 = vadd.f32 %v517_v47, %v470_v42  ;;  %v513_v51 = vcombine.high %v511_v46, %v511_v46  ;;  %v525_v52 = vrot.slane %v512_v48, %v1390_v25  ;;  %v480_v53 = vpop.f32.mrf.mxu1 }
 0x12e   :  { %v535_v54 = vadd.f32 %v1021_v40, %v521_v49  ;;  %1056 = vtanh.f32 %v534_v50  ;;  %v529_v55 = vrot.slane %v513_v51, %v1390_v25  ;;  %v536_v56 = vadd.f32 %v525_v52, %v480_v53 }
 0x130   :  { %1058 = vtanh.f32 %v535_v54  ;;  %v537_v57 = vadd.f32 %v1024_v45, %v529_v55 }
 0x131   :  { %1060 = vtanh.f32 %v536_v56 }
 0x132   :  { %1062 = vtanh.f32 %v537_v57 }
 0x13b   :  { %v1057_v59 = vpop.eup %1056 }
 0x13c   :  { %v549_v60 = vmul.f32 %v1057_v59, %v977_v58 }
 0x13d   :  { %v1059_v61 = vpop.eup %1058 }
 0x13e   :  { %v1061_v62 = vpop.eup %1060  ;;  %553 = vadd.xlane.f32.xlu0 %v549_v60  ;;  %v550_v2 = vmul.f32 %v1059_v61, %v977_v58 }
 0x13f   :  { %v551_v63 = vmul.f32 %v1061_v62, %v977_v58  ;;  %v1063_v1 = vpop.eup %1062 }
 0x140   :  { %v552_v3 = vmul.f32 %v1063_v1, %v977_v58 }
 0x141   :  { %557 = vadd.xlane.f32.xlu1 %v551_v63 }
 0x142   :  { %555 = vadd.xlane.f32.xlu0 %v550_v2 }
 0x145   :  { %559 = vadd.xlane.f32.xlu1 %v552_v3 }
 0x1c7   :  { %v554_v5 = vpop.xlane.xlu0 %553 }
 0x1c8   :  { %v570_v9 = vrot.slane %v554_v5, %v569_v6 }
 0x1ca   :  { %v558_v7 = vpop.xlane.xlu1 %557 }
 0x1cb   :  { %v556_v8 = vpop.xlane.xlu0 %555  ;;  %v578_v11 = vrot.slane %v558_v7, %v569_v6 }
 0x1cc   :  { %v574_v10 = vrot.slane %v556_v8, %v569_v6 }
 0x1ce   :  { %v560_v12 = vpop.xlane.xlu1 %559  ;;  %v584_v13 = vsel %vm583_vm3, %v574_v10, %v570_v9  ;;  %v755_v9 = vld [vmem:[#allocation13 + $0x58] sm:$0xff] }
 0x1cf   :  { %v582_v14 = vrot.slane %v560_v12, %v569_v6  ;;  %v586_v15 = vsel %vm585_vm4, %v578_v11, %v584_v13  ;;  %1026 = vmatpush3.msra.mxu1 %v755_v9  ;;  %v751_v10 = vld [vmem:[#allocation13 + $0x38] sm:$0xff]  ;;  %v750_v11 = vld [vmem:[#allocation13 + $0x30] sm:$0xff]  ;;  %v748_v13 = vld [vmem:[#allocation13 + $0x20] sm:$0xff] }
 0x1d0   :  { %1027 = vmatprep.subr.mxu1 %v1267_v0 }
 0x1d1   :  { %v588_v16 = vsel %vm587_vm5, %v582_v14, %v586_v15  ;;  %v747_v14 = vld [vmem:[#allocation13 + $0x18] sm:$0xff]  ;;  %v749_v15 = vld [vmem:[#allocation13 + $0x28] sm:$0xff] }
 0x1d2   :  { %v591_v17 = vsel %vm590_vm6, %v588_v16, -inf  ;;  %v745_v16 = vld [vmem:[#allocation13 + $0x8] sm:$0xff] }
 0x1d3   :  { %592 = vmax.xlane.f32.xlu0 %v591_v17  ;;  %v744_v17 = vld [vmem:[#allocation13] sm:$0xff] }
 0x25c   :  { %v593_v27 = vpop.xlane.xlu0 %592 }
 0x25d   :  { %v598_v30 = vrot.slane %v593_v27, %v1390_v25  ;;  %v602_v31 = vrot.slane %v593_v27, %v1419_v23  ;;  %v606_v34 = vrot.slane %v593_v27, %v1422_v26  ;;  %v610_v35 = vrot.slane %v593_v27, %v1425_v29 }
 0x25f   :  { %v615_v37 = vsub.f32 %v554_v5, %v598_v30  ;;  %v616_v38 = vsub.f32 %v556_v8, %v602_v31  ;;  %v617_v39 = vsub.f32 %v558_v7, %v606_v34  ;;  %v618_v42 = vsub.f32 %v560_v12, %v610_v35  ;;  %v754_v7 = vld [vmem:[#allocation13 + $0x50] sm:$0xff]  ;;  %v753_v8 = vld [vmem:[#allocation13 + $0x48] sm:$0xff]  ;;  %v752_v12 = vld [vmem:[#allocation13 + $0x40] sm:$0xff] }
 0x260   :  { %806 = vmatprep.subr.mxu0 %v754_v7  ;;  %1028 = vmatpush3.msra.mxu1 %v752_v12 }
 0x261   :  { %v619_v40 = vmul.f32 1.442695, %v615_v37  ;;  %v621_v41 = vmul.f32 1.442695, %v616_v38  ;;  %v623_v43 = vmul.f32 1.442695, %v617_v39  ;;  %807 = vmatpush1.msra.mxu0 %v753_v8  ;;  %1029 = vmatprep.subr.mxu1 %v1267_v0 }
 0x262   :  { %v625_v24 = vmul.f32 1.442695, %v618_v42  ;;  %808 = vmatprep.subr.mxu0 %v751_v10  ;;  %1030 = vmatpush3.msra.mxu1 %v749_v15 }
 0x263   :  { %1064 = vpow2.f32 %v619_v40  ;;  %809 = vmatpush1.msra.mxu0 %v750_v11  ;;  %1031 = vmatprep.subr.mxu1 %v1267_v0  ;;  %v154_v11 = vrot.slane %v1395_v28, %v1422_v26 }
 0x264   :  { %1066 = vpow2.f32 %v621_v41  ;;  %810 = vmatprep.subr.mxu0 %v748_v13  ;;  %1032 = vmatpush3.msra.mxu1 %v746_v18 }
 0x265   :  { %1068 = vpow2.f32 %v623_v43  ;;  %811 = vmatpush1.msra.mxu0 %v747_v14 }
 0x266   :  { %1070 = vpow2.f32 %v625_v24  ;;  %812 = vmatprep.subr.mxu0 %v745_v16  ;;  %v305_v16 = vadd.f32 %v1399_v32, %v154_v11 }
 0x267   :  { %813 = vmatpush1.msra.mxu0 %v744_v17 }
 0x270   :  { %v1065_v44 = vpop.eup %1064 }
 0x271   :  { %v1067_v45 = vpop.eup %1066  ;;  %632 = vperm.xlu1 %1054, %v1065_v44  }
 0x272   :  { %635 = vperm.xlu0 %1055, %v1067_v45   ;;  %v1069_v46 = vpop.eup %1068 }
 0x273   :  { %v1071_v47 = vpop.eup %1070 }
 0x275   :  { %638 = vperm.xlu1 %1054, %v1069_v46  }
 0x279   :  { %641 = vperm.xlu1 %1054, %v1071_v47  }
 0x2ec   :  { %v633_v48 = vpop.permute.xlu1 %632 }
 0x2ed   :  { %v636_v49 = vpop.permute.xlu0 %635  ;;  %v646_v52 = vrot.slane %v633_v48, %v569_v6 }
 0x2ee   :  { %v650_v51 = vrot.slane %v636_v49, %v569_v6 }
 0x2f0   :  { %v639_v50 = vpop.permute.xlu1 %638  ;;  %v659_v55 = vsel %vm583_vm3, %v650_v51, %v646_v52 }
 0x2f1   :  { %v654_v53 = vrot.slane %v639_v50, %v569_v6 }
 0x2f3   :  { %v660_v57 = vsel %vm585_vm4, %v654_v53, %v659_v55 }
 0x2f4   :  { %v642_v54 = vpop.permute.xlu1 %641 }
 0x2f5   :  { %v658_v56 = vrot.slane %v642_v54, %v569_v6 }
 0x2f7   :  { %v661_v58 = vsel %vm587_vm5, %v658_v56, %v660_v57 }
 0x2f8   :  { %v663_v59 = vsel %vm590_vm6, %v661_v58, 0.0 }
 0x2f9   :  { %664 = vadd.xlane.f32.xlu1 %v663_v59 }
 0x382   :  { %v665_v60 = vpop.xlane.xlu1 %664 }
 0x383   :  { %1072 = vrcp.f32 %v665_v60 }
 0x390   :  { %v1073_v61 = vpop.eup %1072 }
 0x391   :  { %v671_v62 = vrot.slane %v1073_v61, %v1390_v25  ;;  %v675_v1 = vrot.slane %v1073_v61, %v1419_v23  ;;  %v679_v3 = vrot.slane %v1073_v61, %v1422_v26  ;;  %v683_v5 = vrot.slane %v1073_v61, %v1425_v29 }
 0x393   :  { %v688_v63 = vmul.f32 %v1065_v44, %v671_v62  ;;  %v689_v2 = vmul.f32 %v1067_v45, %v675_v1  ;;  %v690_v4 = vmul.f32 %v1069_v46, %v679_v3  ;;  %v691_v6 = vmul.f32 %v1071_v47, %v683_v5 }
 0x394   :  { %v150_v3 = vrot.slane %v1395_v28, %v1419_v23 }
 0x395   :  { %694 = vperm.xlu0 %1055, %v688_v63  }
 0x399   :  { %699 = vperm.xlu0 %1055, %v689_v2   ;;  %v756_v2 = vld [vmem:[%s1483_s9] sm:$0x7]  ;;  %s1271_s9 = smov [#allocation14]  }
 0x39a   :  { %v765_v9 = vrot.slane %v756_v2, %v1419_v23  ;;  %v769_v23 = vrot.slane %v756_v2, %v1422_v26 }
 0x39d   :  { %704 = vperm.xlu0 %1055, %v690_v4   ;;  %v761_v4 = vrot.slane %v756_v2, %v1390_v25 }
 0x3a1   :  { %709 = vperm.xlu0 %1055, %v691_v6   ;;  %v236_v6 = vadd.f32 %v1401_v33, %v150_v3 }
 0x410   :  { %v695_v27 = vpop.permute.xlu0 %694 }
 0x411   :  { %v712_v30 = vmul.f32 %v695_v27, %v1366_v19 }
 0x413   :  { %v716_v31 = vsel %vm313_vm1, %v712_v30, 0.0  ;;  %v158_v30 = vrot.slane %v1395_v28, %v1425_v29 }
 0x414   :  { %v717_v34 = vrot.slane %v716_v31, 4  ;;  %v700_v35 = vpop.permute.xlu0 %699 }
 0x415   :  { %v713_v37 = vmul.f32 %v700_v35, %v1369_v20 }
 0x416   :  { %v718_v39 = vadd.f32 %v717_v34, %v716_v31 }
 0x417   :  { %v723_v38 = vsel %vm313_vm1, %v713_v37, 0.0  ;;  %v307_v37 = vadd.f32 %v1404_v36, %v158_v30 }
 0x418   :  { %v724_v40 = vrot.slane %v723_v38, 4  ;;  %v705_v41 = vpop.permute.xlu0 %704  ;;  %v719_v24 = vrot.slane %v718_v39, 2 }
 0x419   :  { %v714_v42 = vmul.f32 %v705_v41, %v1372_v21 }
 0x41a   :  { %v725_v43 = vadd.f32 %v724_v40, %v723_v38  ;;  %v720_v49 = vadd.f32 %v719_v24, %v718_v39 }
 0x41b   :  { %v730_v0 = vsel %vm313_vm1, %v714_v42, 0.0 }
 0x41c   :  { %v726_v44 = vrot.slane %v725_v43, 2  ;;  %v731_v45 = vrot.slane %v730_v0, 4  ;;  %v710_v19 = vpop.permute.xlu0 %709  ;;  %v721_v21 = vrot.slane %v720_v49, 1 }
 0x41d   :  { %v715_v46 = vmul.f32 %v710_v19, %v1381_v22 }
 0x41e   :  { %v727_v47 = vadd.f32 %v726_v44, %v725_v43  ;;  %v732_v48 = vadd.f32 %v731_v45, %v730_v0  ;;  %v722_v60 = vadd.f32 %v721_v21, %v720_v49 }
 0x41f   :  { %v737_v20 = vsel %vm313_vm1, %v715_v46, 0.0 }
 0x420   :  { %v733_v50 = vrot.slane %v732_v48, 2  ;;  %v738_v51 = vrot.slane %v737_v20, 4  ;;  %v728_v52 = vrot.slane %v727_v47, 1 }
 0x422   :  { %v734_v53 = vadd.f32 %v733_v50, %v732_v48  ;;  %v739_v54 = vadd.f32 %v738_v51, %v737_v20  ;;  %v729_v57 = vadd.f32 %v728_v52, %v727_v47 }
 0x424   :  { %v735_v55 = vrot.slane %v734_v53, 1  ;;  %v740_v56 = vrot.slane %v739_v54, 2  ;;  %v777_v22 = vsel %vm583_vm3, %v729_v57, %v722_v60 }
 0x426   :  { %v741_v58 = vadd.f32 %v740_v56, %v739_v54  ;;  %v736_v59 = vadd.f32 %v735_v55, %v734_v53 }
 0x428   :  { %v742_v61 = vrot.slane %v741_v58, 1  ;;  %v778_v63 = vsel %vm585_vm4, %v736_v59, %v777_v22 }
 0x42a   :  { %v743_v62 = vadd.f32 %v742_v61, %v741_v58 }
 0x42c   :  { %v779_v1 = vsel %vm587_vm5, %v743_v62, %v778_v63 }
 0x42d   :  { %947 = vrot.lane.b32.xlu1 %v779_v1, %s1257_s22  ;;  %978 = vmatmul.mubr.msk.f32.vlgmr.msra.gmra.mxu0 %vm313_vm1, %v779_v1  ;;  %s958_s22 = sshll.u32 %s1271_s9, 4  ;;  %s959_s22 = int_to_ptr.vmem [resolvable:$true] %s958_s22 }
 0x42e   :  { %1034 = vmatmul.mubr.msk.f32.vlgmr.msra.gmra.mxu1 %vm313_vm1, %v779_v1  ;;  %s1224_s11 = scalar_lea.vmem %s959_s22, 64  ;;  %p1229_p8 = scmp.lt.s32.totalorder %s959_s22, %s959_s22 }
 0x42f   :  { %p1225_p7 = scmp.ne.s32.totalorder %s959_s22, %s1224_s11  ;;  %p1230_p9 = scmp.lt.s32.totalorder %s1224_s11, %s1224_s11 }
 0x431   :  { %p1231_p10 = por %p1230_p9, %p1229_p8 }
 0x433   :  { %p1232_p11 = pnand %p1231_p10, %p1225_p7 }
 0x49f   :  { %v948_v28 = vpop.permute.xlu1 %947 }
 0x4ed   :  { %v848_v5 = vpop.f32.mrf.mxu0 }
 0x4ee   :  { %v849_v7 = vadd.f32 %v848_v5, %v761_v4  ;;  %v919_v8 = vpop.f32.mrf.mxu1 }
 0x4ef   :  { %v850_v10 = vpop.f32.mrf.mxu0  ;;  %v920_v34 = vadd.f32 %v919_v8, %v769_v23 }
 0x4f0   :  { %v923_v12 = vadd.f32 %v849_v7, %v236_v6  ;;  %v1035_v13 = vpop.f32.mrf.mxu1  ;;  %v851_v15 = vadd.f32 %v850_v10, %v765_v9 }
 0x4f2   :  { %v980_v14 = vmul.f32 -1.442695, %v923_v12  ;;  %v930_v17 = vadd.f32 %v851_v15, %v305_v16 }
 0x4f4   :  { %1074 = vpow2.f32 %v980_v14  ;;  %v981_v25 = vmul.f32 -1.442695, %v930_v17 }
 0x4f6   :  { %1076 = vpow2.f32 %v981_v25 }
 0x501   :  { %v1075_v18 = vpop.eup %1074 }
 0x502   :  { %v927_v33 = vadd.f32 1.0, %v1075_v18 }
 0x503   :  { %v1077_v27 = vpop.eup %1076 }
 0x504   :  { %1078 = vrcp.f32 %v927_v33  ;;  %v934_v31 = vadd.f32 1.0, %v1077_v27 }
 0x506   :  { %1080 = vrcp.f32 %v934_v31 }
 0x511   :  { %v1079_v35 = vpop.eup %1078 }
 0x512   :  { %v937_v38 = vmul.f32 %v1079_v35, %v920_v34 }
 0x513   :  { %v1081_v39 = vpop.eup %1080 }
 0x514   :  { %v938_v32 = vadd.f32 %v937_v38, %v307_v37  ;;  %v940_v40 = vsub.f32 1.0, %v1081_v39  ;;  %v943_v43 = vmul.f32 %v1081_v39, %v779_v1 }
 0x516   :  { %1082 = vtanh.f32 %v938_v32 }
 0x523   :  { %v1083_v41 = vpop.eup %1082 }
 0x524   :  { %v941_v42 = vmul.f32 %v1083_v41, %v940_v40 }
 0x526   :  { %v944_v26 = vadd.f32 %v943_v43, %v941_v42 }
 0x528   :  { %946 = vst.msk [vmem:[#allocation14] sm:$0xf] %vm945_vm7, %v944_v26 }
 0x529   :  { %951 = vst.msk [vmem:[#allocation14] sm:$0xf] %vm950_vm8, %v948_v28 }
 0x52a   :  { %1235 = shalt.err (!%p1232_p11)
}
 0x52b   :  { %961 = dma.vmem_to_hbm [thread:$0]  %s959_s22, 64, %s1484_s10, [#allocation4]  }
 0x52c   :  { %1252 = dma.done.wait [#allocation4], 64  }
 0x52d   :  { %1253 = vsyncadd [#allocation4], 4294967232 }
 0x52e   :  { %965 = vsyncpa [#allocation3], 1 }
 0x52f   :  { %966 = vsyncpa [#allocation6], 1 }
 0x530   :  { %967 = vsyncpa [#allocation9], 1 }
 0x531   :  { %968 = vsyncpa [#allocation12], 1 }
 0x532   :  { %969 = vsyncpa [#allocation4], 1 }

</bundles_post_ra>
